<compile_context>
chip_gen: v7x
topology: tpu7x:2x2x1
jax: 0.10.0
libtpu: 0.0.40
codegen_flags: <defaults>
</compile_context>

<pallas_src>
import functools
import math

import numpy as np
import jax
import jax.numpy as jnp
from jax.experimental import pallas as pl
from jax.experimental.pallas import tpu as pltpu


def _round_up(x, m):
    return (x + m - 1) // m * m


def _vmem_capacity_bytes():
    """Per-core VMEM capacity; conservative 64 MiB (v7x) fallback."""
    try:
        info = pltpu.get_tpu_info()
        cap = int(getattr(info, "vmem_capacity_bytes", 0) or 0)
        if cap > 0:
            return cap
    except Exception:
        pass
    return 64 * 1024 * 1024


def _num_tensorcores():
    """TensorCores per chip (v7x/v4/v5p: 2, v5e/v6e: 1).  Conservative default 1."""
    try:
        dev = jax.devices()[0]
        n = getattr(dev, "num_cores", None)
        if n:
            return int(n)
        kind = str(getattr(dev, "device_kind", "")).lower()
        if "v7" in kind or "v4" in kind or "v5p" in kind:
            return 2
    except Exception:
        pass
    return 1


def _one_hot_expand(x, d, mm_dtype):
    """MXU lane-dense broadcast: xb[t, n*d + j] == x[t, n] (exact one-hot matmul)."""
    nt = x.shape[-1]
    cf = nt * d
    f_idx = jax.lax.broadcasted_iota(jnp.int32, (nt, cf), 1)
    n_idx = jax.lax.broadcasted_iota(jnp.int32, (nt, cf), 0)
    # E[n, f] = 1 iff n*d <= f < (n+1)*d.  Generated in-kernel (cheap VPU work,
    # ~Nt/tb of the FMA cost) -- no HBM stream, no resident VMEM buffer.
    expand = ((f_idx >= n_idx * d) & (f_idx < (n_idx + 1) * d)).astype(mm_dtype)
    return jnp.dot(x.astype(mm_dtype), expand, preferred_element_type=jnp.float32)


def _ne_kernel_bias(x_ref, w_ref, b_ref, o_ref, *, d, mm_dtype):
    # x_ref: (tb, Nt), w_ref/b_ref: (1, Nt*D), o_ref: (tb, Nt*D) lane-dense.
    xb = _one_hot_expand(x_ref[...], d, mm_dtype)
    out = xb * w_ref[...].astype(jnp.float32) + b_ref[...].astype(jnp.float32)
    o_ref[...] = out.astype(o_ref.dtype)


def _ne_kernel_nobias(x_ref, w_ref, o_ref, *, d, mm_dtype):
    xb = _one_hot_expand(x_ref[...], d, mm_dtype)
    o_ref[...] = (xb * w_ref[...].astype(jnp.float32)).astype(o_ref.dtype)


def _choose_block_n(n, d, block_n):
    """N-chunk size: chunk lane width (Nt*D) must be a 128-multiple (or Nt == N)."""
    if block_n is not None:
        assert n % block_n == 0 and (block_n == n or (block_n * d) % 128 == 0), \
            "block_n must divide N and give a lane width that is a multiple of 128"
        return block_n
    # Small expansion: no chunking needed.
    if n * n * d <= (1 << 20):
        return n
    cands = [nt for nt in range(1, n) if n % nt == 0 and (nt * d) % 128 == 0]
    if not cands:
        return n
    dense = [nt for nt in cands if nt * d >= 512]   # keep stores/DMAs wide
    return min(dense) if dense else max(cands)


def numerical_embedding(x, weight, bias=None, *, block_b=None, block_n=None,
                        out_dtype=None, min_pallas_elements=8192):
    """x: (B, N), weight/bias: (N, D) -> (B, N, D).  bias may be None."""
    B, N = x.shape
    N2, D = weight.shape
    assert N == N2, (x.shape, weight.shape)
    if out_dtype is None:
        out_dtype = x.dtype
    with_bias = bias is not None

    # Tiny shapes: XLA's fused broadcast beats kernel launch + per-step overhead.
    if B * N * D < min_pallas_elements:
        out = weight[None] * x[..., None]
        if with_bias:
            out = out + bias[None]
        return out.astype(out_dtype)

    F = N * D
    Nt = _choose_block_n(N, D, block_n)
    Nc = N // Nt
    CF = Nt * D                       # lanes per N-chunk (multiple of 128, or == F)

    # Lane-dense flattened params; x laid out as (Nc, B, Nt) so the chunk axis is
    # a leading dim (keeps the (8,128) rule on x's last two dims).  Nc == 1 is a
    # free reshape; Nc > 1 copies only B*N elements (output/D -- negligible).
    w_flat = weight.reshape(1, F)
    b_flat = bias.reshape(1, F) if with_bias else None
    if Nc == 1:
        x3 = x.reshape(1, B, N)
    else:
        x3 = x.reshape(B, Nc, Nt).transpose(1, 0, 2)

    out_bytes = np.dtype(out_dtype).itemsize
    x_bytes = np.dtype(x.dtype).itemsize
    w_bytes = np.dtype(weight.dtype).itemsize

    # ---- batch-tile sizing (generation-aware VMEM budget) --------------------
    cap = _vmem_capacity_bytes()
    ncores = _num_tensorcores()
    budget = (min(cap, 96 * 1024 * 1024) * 3) // 4
    tile_target = (8 << 20) if cap >= (96 << 20) else (4 << 20)   # output-tile bytes

    if block_b is not None:
        tb = block_b
    else:
        tb = tile_target // max(1, CF * out_bytes)
    tb = max(8, min(tb, 2048)) // 8 * 8
    if tb >= B:
        tb = B                        # full-dim block is legal for any B
    if (block_b is None and ncores > 1 and Nc * pl.cdiv(B, tb) < ncores
            and B >= 8 * ncores):
        # Split a single-tile grid only on multi-TensorCore chips (v7x).  On
        # v5e/v6e the grid is a serial loop: splitting just adds overhead.
        tb = max(8, _round_up(pl.cdiv(B, ncores), 8))

    def vmem_need(rows):
        return (2 * rows * CF * out_bytes        # double-buffered output tile
                + 2 * rows * Nt * x_bytes        # double-buffered x tile
                + 4 * CF * w_bytes               # weight (+ bias) chunks
                + rows * CF * 4                  # f32 matmul/FMA intermediate
                + Nt * CF * 4)                   # in-kernel one-hot expansion

    while tb > 8 and vmem_need(tb) > budget:
        tb = max(8, (tb // 2) // 8 * 8)
    vmem_limit = int(min(max(vmem_need(tb) + (8 << 20), 32 << 20),
                         budget + (8 << 20)))

    grid = (Nc, pl.cdiv(B, tb))       # chunk axis outer -> w/b stay resident
                                      # across the inner batch loop; partial tail
                                      # batch tile is masked (no padding / slice).

    # bf16 one-hot matmul when the output is bf16 (selection exact; only x is
    # rounded); keep the f32 path exact vs. the PyTorch f32 reference.
    mm_dtype = (jnp.bfloat16 if np.dtype(out_dtype) == np.dtype(jnp.bfloat16)
                else jnp.float32)

    x_spec = pl.BlockSpec((None, tb, Nt), lambda j, i: (j, i, 0))
    w_spec = pl.BlockSpec((1, CF), lambda j, i: (0, j))
    o_spec = pl.BlockSpec((tb, CF), lambda j, i: (i, j))

    if with_bias:
        kernel = functools.partial(_ne_kernel_bias, d=D, mm_dtype=mm_dtype)
        in_specs = [x_spec, w_spec, pl.BlockSpec((1, CF), lambda j, i: (0, j))]
        operands = (x3, w_flat, b_flat)
    else:
        kernel = functools.partial(_ne_kernel_nobias, d=D, mm_dtype=mm_dtype)
        in_specs = [x_spec, w_spec]
        operands = (x3, w_flat)

    cost = pl.CostEstimate(
        flops=2 * B * F * Nt + 2 * B * F,        # expansion matmul + broadcast FMA
        transcendentals=0,
        bytes_accessed=int(x.size * x_bytes
                           + (2 if with_bias else 1) * F * w_bytes
                           + B * F * out_bytes),
    )

    out_flat = pl.pallas_call(
        kernel,
        out_shape=jax.ShapeDtypeStruct((B, F), out_dtype),
        grid_spec=pltpu.PrefetchScalarGridSpec(
            num_scalar_prefetch=0,
            grid=grid,
            in_specs=in_specs,
            out_specs=o_spec,
        ),
        compiler_params=pltpu.CompilerParams(
            dimension_semantics=("parallel", "parallel"),
            vmem_limit_bytes=vmem_limit,
        ),
        cost_estimate=cost,
    )(*operands)

    return out_flat.reshape(B, N, D)


def init_params(key, num_embeddings, embedding_dim, bias=True):
    # Reproduce nn.init.kaiming_uniform_(param, a=sqrt(5)) deterministically:
    # 2D (num_embeddings, embedding_dim) -> fan_in = embedding_dim,
    # bound = sqrt(1/fan_in).
    bound = math.sqrt(1.0 / embedding_dim)
    kw, kb = jax.random.split(key)
    weight = jax.random.uniform(
        kw, (num_embeddings, embedding_dim), jnp.float32, -bound, bound)
    b = None
    if bias:
        b = jax.random.uniform(
            kb, (num_embeddings, embedding_dim), jnp.float32, -bound, bound)
    return weight, b


if __name__ == "__main__":
    key = jax.random.PRNGKey(0)
    k_in, k_par, k_in2 = jax.random.split(key, 3)

    B, N, D = 200, 8, 32
    x = jax.random.normal(k_in, (B, N), jnp.float32)
    weight, bias = init_params(k_par, N, D, bias=True)
    ref = weight[None] * x[..., None] + bias[None]

    # Auto tiling (single N-chunk, batch-tiled grid; split only on multi-TC chips).
    out = jax.block_until_ready(numerical_embedding(x, weight, bias))
    assert out.shape == (B, N, D)
    assert jnp.allclose(out, ref, atol=1e-5, rtol=1e-5), "mismatch (auto tile)"

    # Explicit batch tile -> grid with a partial (masked) tail block, no pad/slice.
    out_t = jax.block_until_ready(numerical_embedding(x, weight, bias, block_b=64))
    assert jnp.allclose(out_t, ref, atol=1e-5, rtol=1e-5), "mismatch (tail tile)"

    # Explicit N-chunking (block-diagonal expansion, 2-axis grid).
    xc = jax.random.normal(k_in2, (64, N), jnp.float32)
    ref_c = weight[None] * xc[..., None] + bias[None]
    out_c = jax.block_until_ready(numerical_embedding(xc, weight, bias, block_n=4))
    assert jnp.allclose(out_c, ref_c, atol=1e-5, rtol=1e-5), "mismatch (N-chunk)"

    # bf16 output path (bf16 one-hot expansion matmul on the MXU).
    out_bf = jax.block_until_ready(
        numerical_embedding(x, weight, bias, out_dtype=jnp.bfloat16))
    assert out_bf.dtype == jnp.bfloat16
    assert jnp.allclose(out_bf.astype(jnp.float32), ref, atol=5e-2, rtol=5e-2), \
        "mismatch (bf16)"

    # bias=False module path (specialized kernel, no zeros array streamed).
    w_nb, _ = init_params(k_par, N, D, bias=False)
    out_nb = jax.block_until_ready(numerical_embedding(x, w_nb, None, block_b=64))
    assert jnp.allclose(out_nb, w_nb[None] * x[..., None], atol=1e-5, rtol=1e-5), \
        "mismatch (no-bias)"

    # Tiny shape routes through the jnp fallback (kernel overhead > work there).
    x_s = jax.random.normal(k_in2, (2, 4), jnp.float32)
    w_s, b_s = init_params(k_par, 4, D, bias=True)
    out_s = jax.block_until_ready(numerical_embedding(x_s, w_s, b_s))
    assert jnp.allclose(out_s, w_s[None] * x_s[..., None] + b_s[None], atol=1e-6), \
        "mismatch (fallback)"

    print("KERNEL_OK")
</pallas_src>

<mosaic_0001>
module attributes {stable_mosaic.version = 11 : i64} {
  func.func @_ne_kernel_bias(%arg0: i32, %arg1: i32, %arg2: memref<1x200x8xf32, #tpu.memory_space<vmem>>, %arg3: memref<1x256xf32, #tpu.memory_space<vmem>>, %arg4: memref<1x256xf32, #tpu.memory_space<vmem>>, %arg5: memref<200x256xf32, #tpu.memory_space<vmem>>) attributes {dimension_semantics = [#tpu.dimension_semantics<parallel>, #tpu.dimension_semantics<parallel>], iteration_bounds = array<i64: 1, 1>, scalar_prefetch = 0 : i64, scratch_operands = 0 : i64, tpu.core_type = #tpu.core_type<tc>, window_params = [{transform_indices = @transform_0, window_bounds = array<i64: 1, 200, 8>}, {transform_indices = @transform_1, window_bounds = array<i64: 1, 256>}, {transform_indices = @transform_2, window_bounds = array<i64: 1, 256>}, {transform_indices = @transform_3, window_bounds = array<i64: 200, 256>}]} {
    %c0 = arith.constant 0 : index
    %c0_0 = arith.constant 0 : index
    %c0_1 = arith.constant 0 : index
    %0 = vector.load %arg2[%c0, %c0_0, %c0_1] : memref<1x200x8xf32, #tpu.memory_space<vmem>>, vector<1x200x8xf32>
    %1 = vector.shape_cast %0 : vector<1x200x8xf32> to vector<200x8xf32>
    %2 = tpu.iota {dimensions = array<i32: 1>} : vector<8x256xi32>
    %3 = tpu.iota {dimensions = array<i32: 0>} : vector<8x256xi32>
    %c32_i32 = arith.constant 32 : i32
    %4 = vector.broadcast %c32_i32 : i32 to vector<8x256xi32>
    %5 = arith.muli %3, %4 : vector<8x256xi32>
    %6 = arith.cmpi sge, %2, %5 : vector<8x256xi32>
    %c1_i32 = arith.constant 1 : i32
    %7 = vector.broadcast %c1_i32 : i32 to vector<8x256xi32>
    %8 = arith.addi %3, %7 : vector<8x256xi32>
    %c32_i32_2 = arith.constant 32 : i32
    %9 = vector.broadcast %c32_i32_2 : i32 to vector<8x256xi32>
    %10 = arith.muli %8, %9 : vector<8x256xi32>
    %11 = arith.cmpi slt, %2, %10 : vector<8x256xi32>
    %12 = arith.andi %6, %11 : vector<8x256xi1>
    %13 = arith.extui %12 : vector<8x256xi1> to vector<8x256xi32>
    %14 = arith.sitofp %13 : vector<8x256xi32> to vector<8x256xf32>
    %cst = arith.constant dense<0.000000e+00> : vector<200x256xf32>
    %15 = tpu.matmul %1, %14, %cst {dimension_numbers = #tpu.dot_dimension_numbers<[1], [0], [0], [1], [0, 0, 1, 1], [], []>} : vector<200x8xf32>, vector<8x256xf32>, vector<200x256xf32> -> vector<200x256xf32>
    %c0_3 = arith.constant 0 : index
    %c0_4 = arith.constant 0 : index
    %16 = vector.load %arg3[%c0_3, %c0_4] : memref<1x256xf32, #tpu.memory_space<vmem>>, vector<1x256xf32>
    %17 = vector.broadcast %16 : vector<1x256xf32> to vector<200x256xf32>
    %18 = arith.mulf %15, %17 : vector<200x256xf32>
    %c0_5 = arith.constant 0 : index
    %c0_6 = arith.constant 0 : index
    %19 = vector.load %arg4[%c0_5, %c0_6] : memref<1x256xf32, #tpu.memory_space<vmem>>, vector<1x256xf32>
    %20 = vector.broadcast %19 : vector<1x256xf32> to vector<200x256xf32>
    %21 = arith.addf %18, %20 : vector<200x256xf32>
    %c0_7 = arith.constant 0 : index
    %c0_8 = arith.constant 0 : index
    %22 = vector.load %arg5[%c0_7, %c0_8] : memref<200x256xf32, #tpu.memory_space<vmem>>, vector<200x256xf32>
    tpu.vector_store %arg5[%c0_7, %c0_8], %21 {strides = array<i32>} : memref<200x256xf32, #tpu.memory_space<vmem>>, vector<200x256xf32>,
    return
  }
  func.func @transform_0(%arg0: i32, %arg1: i32) -> (i32, i32, i32) {
    %c0_i32 = arith.constant 0 : i32
    %c0_i32_0 = arith.constant 0 : i32
    return %arg0, %arg1, %c0_i32 : i32, i32, i32
  }
  func.func @transform_1(%arg0: i32, %arg1: i32) -> (i32, i32) {
    %c0_i32 = arith.constant 0 : i32
    %c0_i32_0 = arith.constant 0 : i32
    return %c0_i32, %arg0 : i32, i32
  }
  func.func @transform_2(%arg0: i32, %arg1: i32) -> (i32, i32) {
    %c0_i32 = arith.constant 0 : i32
    %c0_i32_0 = arith.constant 0 : i32
    return %c0_i32, %arg0 : i32, i32
  }
  func.func @transform_3(%arg0: i32, %arg1: i32) -> (i32, i32) {
    %c0_i32 = arith.constant 0 : i32
    return %arg1, %arg0 : i32, i32
  }
}

</mosaic_0001>

<bundles_post_ra>
// kernel: tpu_custom_call.1
= control target key start
LH: loop header
LB: loop body
LE: loop exit
PB: predicated region body
PF: predicated region fallthrough
CT: control target
= control target key end

     0   :  { %v40_v0 = vlaneseq  ;;  %v599_v1 = vmov 0.0   ;;  %vm58_vm5 = vcmask 64512   ;;  %v600_v10 = vmov 1.0   ;;  %s881_s0 = inlined_call_operand.vmem [shape: f32[1,200,8], index: 0, kind: input, shape index: {}]   ;;  %s882_s1 = inlined_call_operand.vmem [shape: f32[1,256], index: 1, kind: input, shape index: {}]   ;;  %s883_s2 = inlined_call_operand.vmem [shape: f32[1,256], index: 2, kind: input, shape index: {}]   ;;  %s884_s3 = inlined_call_operand.hbm [shape: f32[200,256], index: 3, kind: output, shape index: {}]  }
   0x1   :  { %198 = vmatprep.mubr.f32.mxu0 %v599_v1  ;;  %276 = vmatprep.mubr.f32.mxu1 %v599_v1  ;;  %v15_v8 = vld [vmem:[%s881_s0] sm:$0xff]  ;;  %v28_v9 = vld [vmem:[%s881_s0 + $0x68] sm:$0xff] }
   0x2   :  { %v41_v2 = vand.u32 127, %v40_v0  ;;  %v626_v3 = vshrl.u32 %v40_v0, 7 }
   0x4   :  { %v42_v4 = vadd.s32 128, %v41_v2  ;;  %v45_v5 = vmul.u32 32, %v626_v3  ;;  %v48_v6 = vadd.s32 1, %v626_v3 }
   0x6   :  { %vm47_vm0 = vcmp.ge.s32.totalorder %v42_v4, %v45_v5  ;;  %v49_v7 = vmul.u32 32, %v48_v6  ;;  %vm46_vm1 = vcmp.ge.s32.totalorder %v41_v2, %v45_v5 }
   0x8   :  { %vm51_vm2 = vcmp.lt.s32.totalorder %v42_v4, %v49_v7  ;;  %vm50_vm3 = vcmp.lt.s32.totalorder %v41_v2, %v49_v7 }
   0x9   :  { %vm53_vm4 = vmand %vm47_vm0, %vm51_vm2 }
   0xa   :  { %541 = vmatprep.subr.msk.mxu0 %vm53_vm4, %v600_v10  ;;  %vm52_vm6 = vmand %vm46_vm1, %vm50_vm3  ;;  %568 = vmatprep.subr.msk.mxu1 %vm53_vm4, %v600_v10 }
   0xb   :  { %542 = vmatpush1.msk.msra.mxu0 %vm52_vm6, %v600_v10  ;;  %569 = vmatpush1.msk.msra.mxu1 %vm52_vm6, %v600_v10 }
   0xc   :  { %8 = vsyncpa [#allocation3], 0  ;;  %543 = vmatmul.mubr.msk.f32.vlgmr.msra.gmra.mrb[0].mxu0 %vm58_vm5, %v15_v8  ;;  %556 = vmatmul.mubr.msk.f32.vlgmr.msra.gmra.mrb[0].mxu1 %vm58_vm5, %v28_v9  ;;  %v16_v11 = vld [vmem:[%s881_s0 + $0x8] sm:$0xff]  ;;  %v29_v12 = vld [vmem:[%s881_s0 + $0x70] sm:$0xff]  ;;  %v353_v34 = vsub.s32 0, %v626_v3  ;;  %v357_v36 = vsub.s32 1, %v626_v3 }
   0xd   :  { %204 = vmatprep.mubr.f32.mxu0 %v599_v1  ;;  %282 = vmatprep.mubr.f32.mxu1 %v599_v1  ;;  %v17_v13 = vld [vmem:[%s881_s0 + $0x10] sm:$0xff]  ;;  %v30_v14 = vld [vmem:[%s881_s0 + $0x78] sm:$0xff]  ;;  %v31_v16 = vld [vmem:[%s881_s0 + $0x80] sm:$0xff] }
   0xe   :  { %v18_v15 = vld [vmem:[%s881_s0 + $0x18] sm:$0xff]  ;;  %v19_v17 = vld [vmem:[%s881_s0 + $0x20] sm:$0xff]  ;;  %v32_v18 = vld [vmem:[%s881_s0 + $0x88] sm:$0xff] }
   0xf   :  { %v20_v19 = vld [vmem:[%s881_s0 + $0x28] sm:$0xff]  ;;  %v33_v20 = vld [vmem:[%s881_s0 + $0x90] sm:$0xff]  ;;  %v34_v22 = vld [vmem:[%s881_s0 + $0x98] sm:$0xff] }
  0x10   :  { %544 = vmatmul.mubr.msk.f32.gmra.mrb[2].mxu0 %vm58_vm5, %v16_v11  ;;  %557 = vmatmul.mubr.msk.f32.gmra.mrb[2].mxu1 %vm58_vm5, %v29_v12  ;;  %v21_v21 = vld [vmem:[%s881_s0 + $0x30] sm:$0xff]  ;;  %v22_v23 = vld [vmem:[%s881_s0 + $0x38] sm:$0xff]  ;;  %v35_v24 = vld [vmem:[%s881_s0 + $0xa0] sm:$0xff] }
  0x11   :  { %210 = vmatprep.mubr.f32.mxu0 %v599_v1  ;;  %288 = vmatprep.mubr.f32.mxu1 %v599_v1  ;;  %v23_v25 = vld [vmem:[%s881_s0 + $0x40] sm:$0xff]  ;;  %v36_v26 = vld [vmem:[%s881_s0 + $0xa8] sm:$0xff]  ;;  %v37_v28 = vld [vmem:[%s881_s0 + $0xb0] sm:$0xff] }
  0x12   :  { %v24_v27 = vld [vmem:[%s881_s0 + $0x48] sm:$0xff]  ;;  %v25_v29 = vld [vmem:[%s881_s0 + $0x50] sm:$0xff]  ;;  %v38_v30 = vld [vmem:[%s881_s0 + $0xb8] sm:$0xff] }
  0x13   :  { %v26_v31 = vld [vmem:[%s881_s0 + $0x58] sm:$0xff]  ;;  %v39_v32 = vld [vmem:[%s881_s0 + $0xc0] sm:$0xff] }
  0x14   :  { %545 = vmatmul.mubr.msk.f32.gmra.mrb[4].mxu0 %vm58_vm5, %v17_v13  ;;  %558 = vmatmul.mubr.msk.f32.gmra.mrb[4].mxu1 %vm58_vm5, %v30_v14  ;;  %v27_v33 = vld [vmem:[%s881_s0 + $0x60] sm:$0xff]  ;;  %s601_s0 = smov [#allocation2]  }
  0x15   :  { %216 = vmatprep.mubr.f32.mxu0 %v599_v1  ;;  %294 = vmatprep.mubr.f32.mxu1 %v599_v1  ;;  %v349_v35 = vld [vmem:[%s882_s1] sm:$0x3]  ;;  %s528_s1 = sshll.u32 %s601_s0, 4  ;;  %s529_s1 = int_to_ptr.vmem [resolvable:$true] %s528_s1 }
  0x16   :  { %v411_v37 = vld [vmem:[%s883_s2] sm:$0x3]  ;;  %v761_v38 = vrot.slane %v349_v35, %v353_v34  ;;  %v763_v39 = vrot.slane %v349_v35, %v357_v36  ;;  %s575_s2 = scalar_lea.vmem %s529_s1, 6400  ;;  %p580_p1 = scmp.lt.s32.totalorder %s529_s1, %s529_s1 }
  0x17   :  { %v765_v40 = vrot.slane %v411_v37, %v353_v34  ;;  %v767_v41 = vrot.slane %v411_v37, %v357_v36  ;;  %p576_p0 = scmp.ne.s32.totalorder %s529_s1, %s575_s2  ;;  %p581_p2 = scmp.lt.s32.totalorder %s575_s2, %s575_s2 }
  0x18   :  { %546 = vmatmul.mubr.msk.f32.gmra.mrb[6].mxu0 %vm58_vm5, %v18_v15  ;;  %559 = vmatmul.mubr.msk.f32.gmra.mrb[6].mxu1 %vm58_vm5, %v31_v16 }
  0x19   :  { %222 = vmatprep.mubr.f32.mxu0 %v599_v1  ;;  %300 = vmatprep.mubr.f32.mxu1 %v599_v1  ;;  %p582_p3 = por %p581_p2, %p580_p1 }
  0x1b   :  { %p583_p4 = pnand %p582_p3, %p576_p0 }
  0x1c   :  { %547 = vmatmul.mubr.msk.f32.gmra.mrb[8].mxu0 %vm58_vm5, %v19_v17  ;;  %560 = vmatmul.mubr.msk.f32.gmra.mrb[8].mxu1 %vm58_vm5, %v32_v18 }
  0x1d   :  { %228 = vmatprep.mubr.f32.mxu0 %v599_v1  ;;  %306 = vmatprep.mubr.f32.mxu1 %v599_v1 }
  0x20   :  { %548 = vmatmul.mubr.msk.f32.gmra.mrb[10].mxu0 %vm58_vm5, %v20_v19  ;;  %561 = vmatmul.mubr.msk.f32.gmra.mrb[10].mxu1 %vm58_vm5, %v33_v20 }
  0x21   :  { %234 = vmatprep.mubr.f32.mxu0 %v599_v1  ;;  %312 = vmatprep.mubr.f32.mxu1 %v599_v1 }
  0x24   :  { %549 = vmatmul.mubr.msk.f32.gmra.mrb[12].mxu0 %vm58_vm5, %v21_v21  ;;  %562 = vmatmul.mubr.msk.f32.gmra.mrb[12].mxu1 %vm58_vm5, %v34_v22 }
  0x25   :  { %240 = vmatprep.mubr.f32.mxu0 %v599_v1  ;;  %318 = vmatprep.mubr.f32.mxu1 %v599_v1 }
  0x28   :  { %550 = vmatmul.mubr.msk.f32.gmra.mrb[14].mxu0 %vm58_vm5, %v22_v23  ;;  %563 = vmatmul.mubr.msk.f32.gmra.mrb[14].mxu1 %vm58_vm5, %v35_v24 }
  0x29   :  { %246 = vmatprep.mubr.f32.mxu0 %v599_v1  ;;  %324 = vmatprep.mubr.f32.mxu1 %v599_v1 }
  0x2c   :  { %551 = vmatmul.mubr.msk.f32.gmra.mrb[16].mxu0 %vm58_vm5, %v23_v25  ;;  %564 = vmatmul.mubr.msk.f32.gmra.mrb[16].mxu1 %vm58_vm5, %v36_v26 }
  0x2d   :  { %252 = vmatprep.mubr.f32.mxu0 %v599_v1  ;;  %330 = vmatprep.mubr.f32.mxu1 %v599_v1 }
  0x30   :  { %552 = vmatmul.mubr.msk.f32.gmra.mrb[18].mxu0 %vm58_vm5, %v24_v27  ;;  %565 = vmatmul.mubr.msk.f32.gmra.mrb[18].mxu1 %vm58_vm5, %v37_v28 }
  0x31   :  { %258 = vmatprep.mubr.f32.mxu0 %v599_v1  ;;  %336 = vmatprep.mubr.f32.mxu1 %v599_v1 }
  0x34   :  { %553 = vmatmul.mubr.msk.f32.gmra.mrb[20].mxu0 %vm58_vm5, %v25_v29  ;;  %566 = vmatmul.mubr.msk.f32.gmra.mrb[20].mxu1 %vm58_vm5, %v38_v30 }
  0x35   :  { %264 = vmatprep.mubr.f32.mxu0 %v599_v1  ;;  %342 = vmatprep.mubr.f32.mxu1 %v599_v1 }
  0x38   :  { %554 = vmatmul.mubr.msk.f32.gmra.mrb[22].mxu0 %vm58_vm5, %v26_v31  ;;  %567 = vmatmul.mubr.msk.f32.gmra.mrb[22].mxu1 %vm58_vm5, %v39_v32 }
  0x39   :  { %270 = vmatprep.mubr.f32.mxu0 %v599_v1 }
  0x3c   :  { %555 = vmatmul.mubr.msk.f32.gmra.mrb[24].mxu0 %vm58_vm5, %v27_v33 }
  0xdf   :  { %v200_v42 = vpop.f32.mrb[0].mxu0  ;;  %v278_v43 = vpop.f32.mrb[0].mxu1 }
  0xe0   :  { %v361_v44 = vmul.f32 %v761_v38, %v200_v42  ;;  %v202_v45 = vpop.f32.mrb[1].mxu0  ;;  %v387_v46 = vmul.f32 %v761_v38, %v278_v43  ;;  %v280_v47 = vpop.f32.mrb[1].mxu1 }
  0xe1   :  { %v362_v48 = vmul.f32 %v763_v39, %v202_v45  ;;  %v388_v49 = vmul.f32 %v763_v39, %v280_v47 }
  0xe2   :  { %v423_v50 = vadd.f32 %v765_v40, %v361_v44  ;;  %v449_v51 = vadd.f32 %v765_v40, %v387_v46 }
  0xe3   :  { %v424_v52 = vadd.f32 %v767_v41, %v362_v48  ;;  %v206_v53 = vpop.f32.mrb[2].mxu0  ;;  %v450_v54 = vadd.f32 %v767_v41, %v388_v49  ;;  %v284_v55 = vpop.f32.mrb[2].mxu1 }
  0xe4   :  { %473 = vst [vmem:[#allocation2] sm:$0xff] %v423_v50  ;;  %499 = vst [vmem:[#allocation2 + $0xd0] sm:$0xff] %v449_v51  ;;  %v363_v56 = vmul.f32 %v761_v38, %v206_v53  ;;  %v208_v57 = vpop.f32.mrb[3].mxu0  ;;  %v389_v58 = vmul.f32 %v761_v38, %v284_v55  ;;  %v286_v59 = vpop.f32.mrb[3].mxu1 }
  0xe5   :  { %474 = vst [vmem:[#allocation2 + $0x8] sm:$0xff] %v424_v52  ;;  %500 = vst [vmem:[#allocation2 + $0xd8] sm:$0xff] %v450_v54  ;;  %v364_v60 = vmul.f32 %v763_v39, %v208_v57  ;;  %v390_v61 = vmul.f32 %v763_v39, %v286_v59 }
  0xe6   :  { %v425_v62 = vadd.f32 %v765_v40, %v363_v56  ;;  %v451_v63 = vadd.f32 %v765_v40, %v389_v58 }
  0xe7   :  { %v426_v0 = vadd.f32 %v767_v41, %v364_v60  ;;  %v212_v1 = vpop.f32.mrb[4].mxu0  ;;  %v452_v2 = vadd.f32 %v767_v41, %v390_v61  ;;  %v290_v3 = vpop.f32.mrb[4].mxu1 }
  0xe8   :  { %475 = vst [vmem:[#allocation2 + $0x10] sm:$0xff] %v425_v62  ;;  %501 = vst [vmem:[#allocation2 + $0xe0] sm:$0xff] %v451_v63  ;;  %v365_v4 = vmul.f32 %v761_v38, %v212_v1  ;;  %v214_v5 = vpop.f32.mrb[5].mxu0  ;;  %v391_v6 = vmul.f32 %v761_v38, %v290_v3  ;;  %v292_v7 = vpop.f32.mrb[5].mxu1 }
  0xe9   :  { %476 = vst [vmem:[#allocation2 + $0x18] sm:$0xff] %v426_v0  ;;  %502 = vst [vmem:[#allocation2 + $0xe8] sm:$0xff] %v452_v2  ;;  %v366_v8 = vmul.f32 %v763_v39, %v214_v5  ;;  %v392_v9 = vmul.f32 %v763_v39, %v292_v7 }
  0xea   :  { %v427_v10 = vadd.f32 %v765_v40, %v365_v4  ;;  %v453_v11 = vadd.f32 %v765_v40, %v391_v6 }
  0xeb   :  { %v428_v12 = vadd.f32 %v767_v41, %v366_v8  ;;  %v218_v13 = vpop.f32.mrb[6].mxu0  ;;  %v454_v14 = vadd.f32 %v767_v41, %v392_v9  ;;  %v296_v15 = vpop.f32.mrb[6].mxu1 }
  0xec   :  { %477 = vst [vmem:[#allocation2 + $0x20] sm:$0xff] %v427_v10  ;;  %503 = vst [vmem:[#allocation2 + $0xf0] sm:$0xff] %v453_v11  ;;  %v367_v16 = vmul.f32 %v761_v38, %v218_v13  ;;  %v220_v17 = vpop.f32.mrb[7].mxu0  ;;  %v393_v18 = vmul.f32 %v761_v38, %v296_v15  ;;  %v298_v19 = vpop.f32.mrb[7].mxu1 }
  0xed   :  { %478 = vst [vmem:[#allocation2 + $0x28] sm:$0xff] %v428_v12  ;;  %504 = vst [vmem:[#allocation2 + $0xf8] sm:$0xff] %v454_v14  ;;  %v368_v20 = vmul.f32 %v763_v39, %v220_v17  ;;  %v394_v21 = vmul.f32 %v763_v39, %v298_v19 }
  0xee   :  { %v429_v22 = vadd.f32 %v765_v40, %v367_v16  ;;  %v455_v23 = vadd.f32 %v765_v40, %v393_v18 }
  0xef   :  { %v430_v24 = vadd.f32 %v767_v41, %v368_v20  ;;  %v224_v25 = vpop.f32.mrb[8].mxu0  ;;  %v456_v26 = vadd.f32 %v767_v41, %v394_v21  ;;  %v302_v27 = vpop.f32.mrb[8].mxu1 }
  0xf0   :  { %479 = vst [vmem:[#allocation2 + $0x30] sm:$0xff] %v429_v22  ;;  %505 = vst [vmem:[#allocation2 + $0x100] sm:$0xff] %v455_v23  ;;  %v369_v28 = vmul.f32 %v761_v38, %v224_v25  ;;  %v226_v29 = vpop.f32.mrb[9].mxu0  ;;  %v395_v30 = vmul.f32 %v761_v38, %v302_v27  ;;  %v304_v31 = vpop.f32.mrb[9].mxu1 }
  0xf1   :  { %480 = vst [vmem:[#allocation2 + $0x38] sm:$0xff] %v430_v24  ;;  %506 = vst [vmem:[#allocation2 + $0x108] sm:$0xff] %v456_v26  ;;  %v370_v32 = vmul.f32 %v763_v39, %v226_v29  ;;  %v396_v33 = vmul.f32 %v763_v39, %v304_v31 }
  0xf2   :  { %v431_v34 = vadd.f32 %v765_v40, %v369_v28  ;;  %v457_v35 = vadd.f32 %v765_v40, %v395_v30 }
  0xf3   :  { %v432_v36 = vadd.f32 %v767_v41, %v370_v32  ;;  %v230_v37 = vpop.f32.mrb[10].mxu0  ;;  %v458_v42 = vadd.f32 %v767_v41, %v396_v33  ;;  %v308_v43 = vpop.f32.mrb[10].mxu1 }
  0xf4   :  { %481 = vst [vmem:[#allocation2 + $0x40] sm:$0xff] %v431_v34  ;;  %507 = vst [vmem:[#allocation2 + $0x110] sm:$0xff] %v457_v35  ;;  %v371_v44 = vmul.f32 %v761_v38, %v230_v37  ;;  %v232_v45 = vpop.f32.mrb[11].mxu0  ;;  %v397_v46 = vmul.f32 %v761_v38, %v308_v43  ;;  %v310_v47 = vpop.f32.mrb[11].mxu1 }
  0xf5   :  { %482 = vst [vmem:[#allocation2 + $0x48] sm:$0xff] %v432_v36  ;;  %508 = vst [vmem:[#allocation2 + $0x118] sm:$0xff] %v458_v42  ;;  %v372_v48 = vmul.f32 %v763_v39, %v232_v45  ;;  %v398_v49 = vmul.f32 %v763_v39, %v310_v47 }
  0xf6   :  { %v433_v50 = vadd.f32 %v765_v40, %v371_v44  ;;  %v459_v51 = vadd.f32 %v765_v40, %v397_v46 }
  0xf7   :  { %v434_v52 = vadd.f32 %v767_v41, %v372_v48  ;;  %v236_v53 = vpop.f32.mrb[12].mxu0  ;;  %v460_v54 = vadd.f32 %v767_v41, %v398_v49  ;;  %v314_v55 = vpop.f32.mrb[12].mxu1 }
  0xf8   :  { %483 = vst [vmem:[#allocation2 + $0x50] sm:$0xff] %v433_v50  ;;  %509 = vst [vmem:[#allocation2 + $0x120] sm:$0xff] %v459_v51  ;;  %v373_v56 = vmul.f32 %v761_v38, %v236_v53  ;;  %v238_v57 = vpop.f32.mrb[13].mxu0  ;;  %v399_v58 = vmul.f32 %v761_v38, %v314_v55  ;;  %v316_v59 = vpop.f32.mrb[13].mxu1 }
  0xf9   :  { %484 = vst [vmem:[#allocation2 + $0x58] sm:$0xff] %v434_v52  ;;  %510 = vst [vmem:[#allocation2 + $0x128] sm:$0xff] %v460_v54  ;;  %v374_v60 = vmul.f32 %v763_v39, %v238_v57  ;;  %v400_v61 = vmul.f32 %v763_v39, %v316_v59 }
  0xfa   :  { %v435_v62 = vadd.f32 %v765_v40, %v373_v56  ;;  %v461_v63 = vadd.f32 %v765_v40, %v399_v58 }
  0xfb   :  { %v436_v0 = vadd.f32 %v767_v41, %v374_v60  ;;  %v242_v1 = vpop.f32.mrb[14].mxu0  ;;  %v462_v2 = vadd.f32 %v767_v41, %v400_v61  ;;  %v320_v3 = vpop.f32.mrb[14].mxu1 }
  0xfc   :  { %485 = vst [vmem:[#allocation2 + $0x60] sm:$0xff] %v435_v62  ;;  %511 = vst [vmem:[#allocation2 + $0x130] sm:$0xff] %v461_v63  ;;  %v375_v4 = vmul.f32 %v761_v38, %v242_v1  ;;  %v244_v5 = vpop.f32.mrb[15].mxu0  ;;  %v401_v6 = vmul.f32 %v761_v38, %v320_v3  ;;  %v322_v7 = vpop.f32.mrb[15].mxu1 }
  0xfd   :  { %486 = vst [vmem:[#allocation2 + $0x68] sm:$0xff] %v436_v0  ;;  %512 = vst [vmem:[#allocation2 + $0x138] sm:$0xff] %v462_v2  ;;  %v376_v8 = vmul.f32 %v763_v39, %v244_v5  ;;  %v402_v9 = vmul.f32 %v763_v39, %v322_v7 }
  0xfe   :  { %v437_v10 = vadd.f32 %v765_v40, %v375_v4  ;;  %v463_v11 = vadd.f32 %v765_v40, %v401_v6 }
  0xff   :  { %v438_v12 = vadd.f32 %v767_v41, %v376_v8  ;;  %v248_v13 = vpop.f32.mrb[16].mxu0  ;;  %v464_v14 = vadd.f32 %v767_v41, %v402_v9  ;;  %v326_v15 = vpop.f32.mrb[16].mxu1 }
 0x100   :  { %487 = vst [vmem:[#allocation2 + $0x70] sm:$0xff] %v437_v10  ;;  %513 = vst [vmem:[#allocation2 + $0x140] sm:$0xff] %v463_v11  ;;  %v377_v16 = vmul.f32 %v761_v38, %v248_v13  ;;  %v250_v17 = vpop.f32.mrb[17].mxu0  ;;  %v403_v18 = vmul.f32 %v761_v38, %v326_v15  ;;  %v328_v19 = vpop.f32.mrb[17].mxu1 }
 0x101   :  { %488 = vst [vmem:[#allocation2 + $0x78] sm:$0xff] %v438_v12  ;;  %514 = vst [vmem:[#allocation2 + $0x148] sm:$0xff] %v464_v14  ;;  %v378_v20 = vmul.f32 %v763_v39, %v250_v17  ;;  %v404_v21 = vmul.f32 %v763_v39, %v328_v19 }
 0x102   :  { %v439_v22 = vadd.f32 %v765_v40, %v377_v16  ;;  %v465_v23 = vadd.f32 %v765_v40, %v403_v18 }
 0x103   :  { %v440_v24 = vadd.f32 %v767_v41, %v378_v20  ;;  %v254_v25 = vpop.f32.mrb[18].mxu0  ;;  %v466_v26 = vadd.f32 %v767_v41, %v404_v21  ;;  %v332_v27 = vpop.f32.mrb[18].mxu1 }
 0x104   :  { %489 = vst [vmem:[#allocation2 + $0x80] sm:$0xff] %v439_v22  ;;  %515 = vst [vmem:[#allocation2 + $0x150] sm:$0xff] %v465_v23  ;;  %v379_v28 = vmul.f32 %v761_v38, %v254_v25  ;;  %v256_v29 = vpop.f32.mrb[19].mxu0  ;;  %v405_v30 = vmul.f32 %v761_v38, %v332_v27  ;;  %v334_v31 = vpop.f32.mrb[19].mxu1 }
 0x105   :  { %490 = vst [vmem:[#allocation2 + $0x88] sm:$0xff] %v440_v24  ;;  %516 = vst [vmem:[#allocation2 + $0x158] sm:$0xff] %v466_v26  ;;  %v380_v32 = vmul.f32 %v763_v39, %v256_v29  ;;  %v406_v33 = vmul.f32 %v763_v39, %v334_v31 }
 0x106   :  { %v441_v34 = vadd.f32 %v765_v40, %v379_v28  ;;  %v467_v35 = vadd.f32 %v765_v40, %v405_v30 }
 0x107   :  { %v442_v36 = vadd.f32 %v767_v41, %v380_v32  ;;  %v260_v37 = vpop.f32.mrb[20].mxu0  ;;  %v468_v42 = vadd.f32 %v767_v41, %v406_v33  ;;  %v338_v43 = vpop.f32.mrb[20].mxu1 }
 0x108   :  { %491 = vst [vmem:[#allocation2 + $0x90] sm:$0xff] %v441_v34  ;;  %517 = vst [vmem:[#allocation2 + $0x160] sm:$0xff] %v467_v35  ;;  %v381_v44 = vmul.f32 %v761_v38, %v260_v37  ;;  %v262_v45 = vpop.f32.mrb[21].mxu0  ;;  %v407_v46 = vmul.f32 %v761_v38, %v338_v43  ;;  %v340_v47 = vpop.f32.mrb[21].mxu1 }
 0x109   :  { %492 = vst [vmem:[#allocation2 + $0x98] sm:$0xff] %v442_v36  ;;  %518 = vst [vmem:[#allocation2 + $0x168] sm:$0xff] %v468_v42  ;;  %v382_v48 = vmul.f32 %v763_v39, %v262_v45  ;;  %v408_v49 = vmul.f32 %v763_v39, %v340_v47 }
 0x10a   :  { %v443_v50 = vadd.f32 %v765_v40, %v381_v44  ;;  %v469_v51 = vadd.f32 %v765_v40, %v407_v46 }
 0x10b   :  { %v444_v52 = vadd.f32 %v767_v41, %v382_v48  ;;  %v266_v53 = vpop.f32.mrb[22].mxu0  ;;  %v470_v54 = vadd.f32 %v767_v41, %v408_v49  ;;  %v344_v55 = vpop.f32.mrb[22].mxu1 }
 0x10c   :  { %493 = vst [vmem:[#allocation2 + $0xa0] sm:$0xff] %v443_v50  ;;  %519 = vst [vmem:[#allocation2 + $0x170] sm:$0xff] %v469_v51  ;;  %v383_v56 = vmul.f32 %v761_v38, %v266_v53  ;;  %v268_v57 = vpop.f32.mrb[23].mxu0  ;;  %v409_v58 = vmul.f32 %v761_v38, %v344_v55  ;;  %v346_v59 = vpop.f32.mrb[23].mxu1 }
 0x10d   :  { %494 = vst [vmem:[#allocation2 + $0xa8] sm:$0xff] %v444_v52  ;;  %520 = vst [vmem:[#allocation2 + $0x178] sm:$0xff] %v470_v54  ;;  %v384_v60 = vmul.f32 %v763_v39, %v268_v57  ;;  %v410_v61 = vmul.f32 %v763_v39, %v346_v59 }
 0x10e   :  { %v445_v62 = vadd.f32 %v765_v40, %v383_v56  ;;  %v471_v63 = vadd.f32 %v765_v40, %v409_v58 }
 0x10f   :  { %v446_v0 = vadd.f32 %v767_v41, %v384_v60  ;;  %v272_v1 = vpop.f32.mrb[24].mxu0  ;;  %v472_v2 = vadd.f32 %v767_v41, %v410_v61 }
 0x110   :  { %495 = vst [vmem:[#allocation2 + $0xb0] sm:$0xff] %v445_v62  ;;  %521 = vst [vmem:[#allocation2 + $0x180] sm:$0xff] %v471_v63  ;;  %v385_v3 = vmul.f32 %v761_v38, %v272_v1  ;;  %v274_v4 = vpop.f32.mrb[25].mxu0 }
 0x111   :  { %496 = vst [vmem:[#allocation2 + $0xb8] sm:$0xff] %v446_v0  ;;  %522 = vst [vmem:[#allocation2 + $0x188] sm:$0xff] %v472_v2  ;;  %v386_v5 = vmul.f32 %v763_v39, %v274_v4 }
 0x112   :  { %v447_v6 = vadd.f32 %v765_v40, %v385_v3 }
 0x113   :  { %v448_v7 = vadd.f32 %v767_v41, %v386_v5 }
 0x114   :  { %497 = vst [vmem:[#allocation2 + $0xc0] sm:$0xff] %v447_v6 }
 0x115   :  { %498 = vst [vmem:[#allocation2 + $0xc8] sm:$0xff] %v448_v7 }
 0x116   :  { %586 = shalt.err (!%p583_p4)
}
 0x117   :  { %s587_s14 = scalar_lea.hbm %s884_s3, 6400 }
 0x118   :  { %p588_p5 = scmp.ne.s32.totalorder %s884_s3, %s587_s14  ;;  %p591_p6 = scmp.lt.u32.totalorder %s587_s14, %s884_s3 }
 0x11a   :  { %p593_p7 = pnand %p591_p6, %p588_p5 }
 0x11c   :  { %596 = shalt.err (!%p593_p7)
}
 0x11d   :  { %s602_s19 = smov 256   ;;  %s603_s20 = smov 16  }
 0x11e   :  { %534 = dma.vmem_to_hbm [thread:$0]  %s529_s1, 6400, %s884_s3, [#allocation3], %s602_s19, %s602_s19, %s603_s20  }
 0x11f   :  { %597 = dma.done.wait [#allocation3], 6400  }
 0x120   :  { %598 = vsyncadd [#allocation3], 4294960896 }
 0x121   :  { %538 = vsyncpa [#allocation3], 1 }

</bundles_post_ra>
